<compile_context>
chip_gen: v5e
topology: v5e:2x2
jax: 0.10.0
libtpu: 0.0.40
codegen_flags: <defaults>
</compile_context>

<pallas_src>
import jax
import jax.numpy as jnp
from jax.experimental import pallas as pl
from jax.experimental.pallas import tpu as pltpu

_HIDDEN = 10      # fc1 output features
_LANE = 128       # TPU lane width
_SUBLANE = 8      # TPU sublane count
_MAX_TILE_ROWS = 8192   # 8192 rows * 128 lanes -> ~24 MiB double-buffered working set


def _cdiv(a, b):
    return (a + b - 1) // b


def _round_up(a, b):
    return _cdiv(a, b) * b


def scorenet_kernel(x_ref, w1_ref, b1_ref, w2_ref, b2_ref, o_ref):
    """One (tile_rows, 128) lane/sublane-dense tile of the fused ScoreNet forward.

    x_ref : (2, tile_rows, 128) VMEM  - features on the leading axis, batch dense
    w1_ref: (2, 10)  SMEM  - 0.5 * fc1.weight.T   (tanh half-angle prescale)
    b1_ref: (10,)    SMEM  - 0.5 * fc1.bias
    w2_ref: (10,)    SMEM  - 0.5 * fc2.weight
    b2_ref: (1,)     SMEM  - fc2.bias + 0.5 * sum(fc2.weight)
    o_ref : (tile_rows, 128) VMEM
    """
    x0 = x_ref[0]                        # (tile_rows, 128) f32
    x1 = x_ref[1]                        # (tile_rows, 128) f32

    # out = b2' + sum_j w2'[j] * tanh(w1'[0,j]*x0 + w1'[1,j]*x1 + b1'[j])
    acc = jnp.zeros_like(x0) + b2_ref[0]
    for j in range(_HIDDEN):             # unrolled at trace time (10 iters)
        z = w1_ref[0, j] * x0 + w1_ref[1, j] * x1 + b1_ref[j]
        acc = acc + w2_ref[j] * jnp.tanh(z)   # tanh -> EUP slot

    o_ref[...] = acc.astype(o_ref.dtype)


def scorenet_forward(x, w1, b1, w2, b2, *, tile_rows=4096):
    """x: (N, 2) f32; w1: (2, 10); b1: (10,); w2: (10,); b2: (1,) -> (N, 1) f32.

    tile_rows = rows of 128 points per grid step (rounded to a multiple of 8).
    """
    n = x.shape[0]

    # --- batch tiling: rows of 128 points, sublane-aligned ------------------
    rows = max(1, _cdiv(n, _LANE))                  # 128-point rows needed
    rows8 = _round_up(rows, _SUBLANE)               # sublane-aligned row count

    tr = max(_SUBLANE, (int(tile_rows) // _SUBLANE) * _SUBLANE)  # multiple of 8
    tr = min(tr, _MAX_TILE_ROWS)                    # VMEM-safe (v7x 64 MiB)
    # cap so the grid has >= 2 programs when possible (v7x: 2 TensorCores)
    half = _round_up(_cdiv(rows8, 2), _SUBLANE)
    tr = min(tr, max(_SUBLANE, half))

    rows_pad = _round_up(rows8, tr)
    grid = (rows_pad // tr,)
    n_pad = rows_pad * _LANE

    # --- single-pass layout plumbing: pad -> reshape -> transpose -----------
    # (no zeros+scatter; padded lanes compute tanh(b1') on x=0, which is finite
    #  and sliced off below)
    xp = jnp.pad(x.astype(jnp.float32), ((0, n_pad - n), (0, 0)))   # (n_pad, 2)
    xt = xp.reshape(rows_pad, _LANE, 2).transpose(2, 0, 1)          # (2, rows, 128)

    # --- fold sigmoid(z) = 0.5 + 0.5*tanh(z/2) into the tiny weights --------
    w1h = (0.5 * w1).astype(jnp.float32)                 # (2, 10)
    b1h = (0.5 * b1).astype(jnp.float32)                 # (10,)
    w2h = (0.5 * w2).astype(jnp.float32)                 # (10,)
    b2h = (b2 + 0.5 * jnp.sum(w2)).astype(jnp.float32)   # (1,)

    smem_spec = pl.BlockSpec(memory_space=pltpu.MemorySpace.SMEM)

    out = pl.pallas_call(
        scorenet_kernel,
        out_shape=jax.ShapeDtypeStruct((rows_pad, _LANE), jnp.float32),
        grid=grid,
        in_specs=[
            pl.BlockSpec((2, tr, _LANE), lambda i: (0, i, 0)),   # x tile
            smem_spec,                                           # w1'
            smem_spec,                                           # b1'
            smem_spec,                                           # w2'
            smem_spec,                                           # b2'
        ],
        out_specs=pl.BlockSpec((tr, _LANE), lambda i: (i, 0)),
        compiler_params=pltpu.CompilerParams(
            dimension_semantics=("parallel",)),                  # megacore on v7x
    )(xt, w1h, b1h, w2h, b2h)

    return out.reshape(n_pad)[:n][:, None]                       # torch's (N, 1)


def init_params(key):
    # Deterministic synthetic init mimicking nn.Linear's uniform(-1/sqrt(fan_in), ...).
    k1, k2, k3, k4 = jax.random.split(key, 4)
    bound1 = 1.0 / jnp.sqrt(2.0)
    bound2 = 1.0 / jnp.sqrt(10.0)
    w1 = jax.random.uniform(k1, (2, _HIDDEN), jnp.float32, -bound1, bound1)  # fc1.weight.T
    b1 = jax.random.uniform(k2, (_HIDDEN,), jnp.float32, -bound1, bound1)    # fc1.bias
    w2 = jax.random.uniform(k3, (_HIDDEN,), jnp.float32, -bound2, bound2)    # fc2.weight
    b2 = jax.random.uniform(k4, (1,), jnp.float32, -bound2, bound2)          # fc2.bias
    return w1, b1, w2, b2


def reference_forward(x, w1, b1, w2, b2):
    h = jax.nn.sigmoid(x @ w1 + b1[None, :])
    return h @ w2[:, None] + b2[None, :]


if __name__ == "__main__":
    key = jax.random.PRNGKey(0)
    k_x, k_x2, k_p = jax.random.split(key, 3)
    w1, b1, w2, b2 = init_params(k_p)

    # Small batch: exercises lane/sublane padding (300 -> 8 rows x 128) on a 1-program grid.
    N1 = 300
    x1 = jax.random.normal(k_x, (N1, 2), jnp.float32)
    out1 = jax.block_until_ready(scorenet_forward(x1, w1, b1, w2, b2))
    ref1 = reference_forward(x1, w1, b1, w2, b2)
    assert out1.shape == (N1, 1)
    assert jnp.allclose(out1, ref1, atol=1e-5, rtol=1e-5), "mismatch vs reference (N=300)"

    # Larger batch: exercises the multi-program (>=2 tiles) pipelined path.
    N2 = 3000
    x2 = jax.random.normal(k_x2, (N2, 2), jnp.float32)
    out2 = jax.block_until_ready(scorenet_forward(x2, w1, b1, w2, b2))
    ref2 = reference_forward(x2, w1, b1, w2, b2)
    assert out2.shape == (N2, 1)
    assert jnp.allclose(out2, ref2, atol=1e-5, rtol=1e-5), "mismatch vs reference (N=3000)"

    print("KERNEL_OK")
</pallas_src>

<mosaic_0001>
module attributes {stable_mosaic.version = 11 : i64} {
  func.func @scorenet_kernel(%arg0: i32, %arg1: memref<2x8x128xf32, #tpu.memory_space<vmem>>, %arg2: memref<2x10xf32, #tpu.memory_space<smem>>, %arg3: memref<10xf32, #tpu.memory_space<smem>>, %arg4: memref<10xf32, #tpu.memory_space<smem>>, %arg5: memref<1xf32, #tpu.memory_space<smem>>, %arg6: memref<8x128xf32, #tpu.memory_space<vmem>>) attributes {dimension_semantics = [#tpu.dimension_semantics<parallel>], iteration_bounds = array<i64: 1>, scalar_prefetch = 0 : i64, scratch_operands = 0 : i64, tpu.core_type = #tpu.core_type<tc>, window_params = [{transform_indices = @transform_0, window_bounds = array<i64: 2, 8, 128>}, {transform_indices = @transform_1, window_bounds = array<i64: 2, 10>}, {transform_indices = @transform_2, window_bounds = array<i64: 10>}, {transform_indices = @transform_3, window_bounds = array<i64: 10>}, {transform_indices = @transform_4, window_bounds = array<i64: 1>}, {transform_indices = @transform_5, window_bounds = array<i64: 8, 128>}]} {
    %c0 = arith.constant 0 : index
    %c0_0 = arith.constant 0 : index
    %c0_1 = arith.constant 0 : index
    %0 = vector.load %arg1[%c0, %c0_0, %c0_1] : memref<2x8x128xf32, #tpu.memory_space<vmem>>, vector<1x8x128xf32>
    %1 = vector.shape_cast %0 : vector<1x8x128xf32> to vector<8x128xf32>
    %c1 = arith.constant 1 : index
    %c0_2 = arith.constant 0 : index
    %c0_3 = arith.constant 0 : index
    %2 = vector.load %arg1[%c1, %c0_2, %c0_3] : memref<2x8x128xf32, #tpu.memory_space<vmem>>, vector<1x8x128xf32>
    %3 = vector.shape_cast %2 : vector<1x8x128xf32> to vector<8x128xf32>
    %cst = arith.constant 0.000000e+00 : f32
    %4 = vector.broadcast %cst : f32 to vector<8x128xf32>
    %c0_4 = arith.constant 0 : index
    %5 = memref.load %arg5[%c0_4] : memref<1xf32, #tpu.memory_space<smem>>
    %6 = vector.broadcast %5 : f32 to vector<8x128xf32>
    %7 = arith.addf %4, %6 : vector<8x128xf32>
    %c0_5 = arith.constant 0 : index
    %c0_6 = arith.constant 0 : index
    %8 = memref.load %arg2[%c0_5, %c0_6] : memref<2x10xf32, #tpu.memory_space<smem>>
    %9 = vector.broadcast %8 : f32 to vector<8x128xf32>
    %10 = arith.mulf %9, %1 : vector<8x128xf32>
    %c1_7 = arith.constant 1 : index
    %c0_8 = arith.constant 0 : index
    %11 = memref.load %arg2[%c1_7, %c0_8] : memref<2x10xf32, #tpu.memory_space<smem>>
    %12 = vector.broadcast %11 : f32 to vector<8x128xf32>
    %13 = arith.mulf %12, %3 : vector<8x128xf32>
    %14 = arith.addf %10, %13 : vector<8x128xf32>
    %c0_9 = arith.constant 0 : index
    %15 = memref.load %arg3[%c0_9] : memref<10xf32, #tpu.memory_space<smem>>
    %16 = vector.broadcast %15 : f32 to vector<8x128xf32>
    %17 = arith.addf %14, %16 : vector<8x128xf32>
    %c0_10 = arith.constant 0 : index
    %18 = memref.load %arg4[%c0_10] : memref<10xf32, #tpu.memory_space<smem>>
    %19 = math.tanh %17 : vector<8x128xf32>
    %20 = vector.broadcast %18 : f32 to vector<8x128xf32>
    %21 = arith.mulf %20, %19 : vector<8x128xf32>
    %22 = arith.addf %7, %21 : vector<8x128xf32>
    %c0_11 = arith.constant 0 : index
    %c1_12 = arith.constant 1 : index
    %23 = memref.load %arg2[%c0_11, %c1_12] : memref<2x10xf32, #tpu.memory_space<smem>>
    %24 = vector.broadcast %23 : f32 to vector<8x128xf32>
    %25 = arith.mulf %24, %1 : vector<8x128xf32>
    %c1_13 = arith.constant 1 : index
    %c1_14 = arith.constant 1 : index
    %26 = memref.load %arg2[%c1_13, %c1_14] : memref<2x10xf32, #tpu.memory_space<smem>>
    %27 = vector.broadcast %26 : f32 to vector<8x128xf32>
    %28 = arith.mulf %27, %3 : vector<8x128xf32>
    %29 = arith.addf %25, %28 : vector<8x128xf32>
    %c1_15 = arith.constant 1 : index
    %30 = memref.load %arg3[%c1_15] : memref<10xf32, #tpu.memory_space<smem>>
    %31 = vector.broadcast %30 : f32 to vector<8x128xf32>
    %32 = arith.addf %29, %31 : vector<8x128xf32>
    %c1_16 = arith.constant 1 : index
    %33 = memref.load %arg4[%c1_16] : memref<10xf32, #tpu.memory_space<smem>>
    %34 = math.tanh %32 : vector<8x128xf32>
    %35 = vector.broadcast %33 : f32 to vector<8x128xf32>
    %36 = arith.mulf %35, %34 : vector<8x128xf32>
    %37 = arith.addf %22, %36 : vector<8x128xf32>
    %c0_17 = arith.constant 0 : index
    %c2 = arith.constant 2 : index
    %38 = memref.load %arg2[%c0_17, %c2] : memref<2x10xf32, #tpu.memory_space<smem>>
    %39 = vector.broadcast %38 : f32 to vector<8x128xf32>
    %40 = arith.mulf %39, %1 : vector<8x128xf32>
    %c1_18 = arith.constant 1 : index
    %c2_19 = arith.constant 2 : index
    %41 = memref.load %arg2[%c1_18, %c2_19] : memref<2x10xf32, #tpu.memory_space<smem>>
    %42 = vector.broadcast %41 : f32 to vector<8x128xf32>
    %43 = arith.mulf %42, %3 : vector<8x128xf32>
    %44 = arith.addf %40, %43 : vector<8x128xf32>
    %c2_20 = arith.constant 2 : index
    %45 = memref.load %arg3[%c2_20] : memref<10xf32, #tpu.memory_space<smem>>
    %46 = vector.broadcast %45 : f32 to vector<8x128xf32>
    %47 = arith.addf %44, %46 : vector<8x128xf32>
    %c2_21 = arith.constant 2 : index
    %48 = memref.load %arg4[%c2_21] : memref<10xf32, #tpu.memory_space<smem>>
    %49 = math.tanh %47 : vector<8x128xf32>
    %50 = vector.broadcast %48 : f32 to vector<8x128xf32>
    %51 = arith.mulf %50, %49 : vector<8x128xf32>
    %52 = arith.addf %37, %51 : vector<8x128xf32>
    %c0_22 = arith.constant 0 : index
    %c3 = arith.constant 3 : index
    %53 = memref.load %arg2[%c0_22, %c3] : memref<2x10xf32, #tpu.memory_space<smem>>
    %54 = vector.broadcast %53 : f32 to vector<8x128xf32>
    %55 = arith.mulf %54, %1 : vector<8x128xf32>
    %c1_23 = arith.constant 1 : index
    %c3_24 = arith.constant 3 : index
    %56 = memref.load %arg2[%c1_23, %c3_24] : memref<2x10xf32, #tpu.memory_space<smem>>
    %57 = vector.broadcast %56 : f32 to vector<8x128xf32>
    %58 = arith.mulf %57, %3 : vector<8x128xf32>
    %59 = arith.addf %55, %58 : vector<8x128xf32>
    %c3_25 = arith.constant 3 : index
    %60 = memref.load %arg3[%c3_25] : memref<10xf32, #tpu.memory_space<smem>>
    %61 = vector.broadcast %60 : f32 to vector<8x128xf32>
    %62 = arith.addf %59, %61 : vector<8x128xf32>
    %c3_26 = arith.constant 3 : index
    %63 = memref.load %arg4[%c3_26] : memref<10xf32, #tpu.memory_space<smem>>
    %64 = math.tanh %62 : vector<8x128xf32>
    %65 = vector.broadcast %63 : f32 to vector<8x128xf32>
    %66 = arith.mulf %65, %64 : vector<8x128xf32>
    %67 = arith.addf %52, %66 : vector<8x128xf32>
    %c0_27 = arith.constant 0 : index
    %c4 = arith.constant 4 : index
    %68 = memref.load %arg2[%c0_27, %c4] : memref<2x10xf32, #tpu.memory_space<smem>>
    %69 = vector.broadcast %68 : f32 to vector<8x128xf32>
    %70 = arith.mulf %69, %1 : vector<8x128xf32>
    %c1_28 = arith.constant 1 : index
    %c4_29 = arith.constant 4 : index
    %71 = memref.load %arg2[%c1_28, %c4_29] : memref<2x10xf32, #tpu.memory_space<smem>>
    %72 = vector.broadcast %71 : f32 to vector<8x128xf32>
    %73 = arith.mulf %72, %3 : vector<8x128xf32>
    %74 = arith.addf %70, %73 : vector<8x128xf32>
    %c4_30 = arith.constant 4 : index
    %75 = memref.load %arg3[%c4_30] : memref<10xf32, #tpu.memory_space<smem>>
    %76 = vector.broadcast %75 : f32 to vector<8x128xf32>
    %77 = arith.addf %74, %76 : vector<8x128xf32>
    %c4_31 = arith.constant 4 : index
    %78 = memref.load %arg4[%c4_31] : memref<10xf32, #tpu.memory_space<smem>>
    %79 = math.tanh %77 : vector<8x128xf32>
    %80 = vector.broadcast %78 : f32 to vector<8x128xf32>
    %81 = arith.mulf %80, %79 : vector<8x128xf32>
    %82 = arith.addf %67, %81 : vector<8x128xf32>
    %c0_32 = arith.constant 0 : index
    %c5 = arith.constant 5 : index
    %83 = memref.load %arg2[%c0_32, %c5] : memref<2x10xf32, #tpu.memory_space<smem>>
    %84 = vector.broadcast %83 : f32 to vector<8x128xf32>
    %85 = arith.mulf %84, %1 : vector<8x128xf32>
    %c1_33 = arith.constant 1 : index
    %c5_34 = arith.constant 5 : index
    %86 = memref.load %arg2[%c1_33, %c5_34] : memref<2x10xf32, #tpu.memory_space<smem>>
    %87 = vector.broadcast %86 : f32 to vector<8x128xf32>
    %88 = arith.mulf %87, %3 : vector<8x128xf32>
    %89 = arith.addf %85, %88 : vector<8x128xf32>
    %c5_35 = arith.constant 5 : index
    %90 = memref.load %arg3[%c5_35] : memref<10xf32, #tpu.memory_space<smem>>
    %91 = vector.broadcast %90 : f32 to vector<8x128xf32>
    %92 = arith.addf %89, %91 : vector<8x128xf32>
    %c5_36 = arith.constant 5 : index
    %93 = memref.load %arg4[%c5_36] : memref<10xf32, #tpu.memory_space<smem>>
    %94 = math.tanh %92 : vector<8x128xf32>
    %95 = vector.broadcast %93 : f32 to vector<8x128xf32>
    %96 = arith.mulf %95, %94 : vector<8x128xf32>
    %97 = arith.addf %82, %96 : vector<8x128xf32>
    %c0_37 = arith.constant 0 : index
    %c6 = arith.constant 6 : index
    %98 = memref.load %arg2[%c0_37, %c6] : memref<2x10xf32, #tpu.memory_space<smem>>
    %99 = vector.broadcast %98 : f32 to vector<8x128xf32>
    %100 = arith.mulf %99, %1 : vector<8x128xf32>
    %c1_38 = arith.constant 1 : index
    %c6_39 = arith.constant 6 : index
    %101 = memref.load %arg2[%c1_38, %c6_39] : memref<2x10xf32, #tpu.memory_space<smem>>
    %102 = vector.broadcast %101 : f32 to vector<8x128xf32>
    %103 = arith.mulf %102, %3 : vector<8x128xf32>
    %104 = arith.addf %100, %103 : vector<8x128xf32>
    %c6_40 = arith.constant 6 : index
    %105 = memref.load %arg3[%c6_40] : memref<10xf32, #tpu.memory_space<smem>>
    %106 = vector.broadcast %105 : f32 to vector<8x128xf32>
    %107 = arith.addf %104, %106 : vector<8x128xf32>
    %c6_41 = arith.constant 6 : index
    %108 = memref.load %arg4[%c6_41] : memref<10xf32, #tpu.memory_space<smem>>
    %109 = math.tanh %107 : vector<8x128xf32>
    %110 = vector.broadcast %108 : f32 to vector<8x128xf32>
    %111 = arith.mulf %110, %109 : vector<8x128xf32>
    %112 = arith.addf %97, %111 : vector<8x128xf32>
    %c0_42 = arith.constant 0 : index
    %c7 = arith.constant 7 : index
    %113 = memref.load %arg2[%c0_42, %c7] : memref<2x10xf32, #tpu.memory_space<smem>>
    %114 = vector.broadcast %113 : f32 to vector<8x128xf32>
    %115 = arith.mulf %114, %1 : vector<8x128xf32>
    %c1_43 = arith.constant 1 : index
    %c7_44 = arith.constant 7 : index
    %116 = memref.load %arg2[%c1_43, %c7_44] : memref<2x10xf32, #tpu.memory_space<smem>>
    %117 = vector.broadcast %116 : f32 to vector<8x128xf32>
    %118 = arith.mulf %117, %3 : vector<8x128xf32>
    %119 = arith.addf %115, %118 : vector<8x128xf32>
    %c7_45 = arith.constant 7 : index
    %120 = memref.load %arg3[%c7_45] : memref<10xf32, #tpu.memory_space<smem>>
    %121 = vector.broadcast %120 : f32 to vector<8x128xf32>
    %122 = arith.addf %119, %121 : vector<8x128xf32>
    %c7_46 = arith.constant 7 : index
    %123 = memref.load %arg4[%c7_46] : memref<10xf32, #tpu.memory_space<smem>>
    %124 = math.tanh %122 : vector<8x128xf32>
    %125 = vector.broadcast %123 : f32 to vector<8x128xf32>
    %126 = arith.mulf %125, %124 : vector<8x128xf32>
    %127 = arith.addf %112, %126 : vector<8x128xf32>
    %c0_47 = arith.constant 0 : index
    %c8 = arith.constant 8 : index
    %128 = memref.load %arg2[%c0_47, %c8] : memref<2x10xf32, #tpu.memory_space<smem>>
    %129 = vector.broadcast %128 : f32 to vector<8x128xf32>
    %130 = arith.mulf %129, %1 : vector<8x128xf32>
    %c1_48 = arith.constant 1 : index
    %c8_49 = arith.constant 8 : index
    %131 = memref.load %arg2[%c1_48, %c8_49] : memref<2x10xf32, #tpu.memory_space<smem>>
    %132 = vector.broadcast %131 : f32 to vector<8x128xf32>
    %133 = arith.mulf %132, %3 : vector<8x128xf32>
    %134 = arith.addf %130, %133 : vector<8x128xf32>
    %c8_50 = arith.constant 8 : index
    %135 = memref.load %arg3[%c8_50] : memref<10xf32, #tpu.memory_space<smem>>
    %136 = vector.broadcast %135 : f32 to vector<8x128xf32>
    %137 = arith.addf %134, %136 : vector<8x128xf32>
    %c8_51 = arith.constant 8 : index
    %138 = memref.load %arg4[%c8_51] : memref<10xf32, #tpu.memory_space<smem>>
    %139 = math.tanh %137 : vector<8x128xf32>
    %140 = vector.broadcast %138 : f32 to vector<8x128xf32>
    %141 = arith.mulf %140, %139 : vector<8x128xf32>
    %142 = arith.addf %127, %141 : vector<8x128xf32>
    %c0_52 = arith.constant 0 : index
    %c9 = arith.constant 9 : index
    %143 = memref.load %arg2[%c0_52, %c9] : memref<2x10xf32, #tpu.memory_space<smem>>
    %144 = vector.broadcast %143 : f32 to vector<8x128xf32>
    %145 = arith.mulf %144, %1 : vector<8x128xf32>
    %c1_53 = arith.constant 1 : index
    %c9_54 = arith.constant 9 : index
    %146 = memref.load %arg2[%c1_53, %c9_54] : memref<2x10xf32, #tpu.memory_space<smem>>
    %147 = vector.broadcast %146 : f32 to vector<8x128xf32>
    %148 = arith.mulf %147, %3 : vector<8x128xf32>
    %149 = arith.addf %145, %148 : vector<8x128xf32>
    %c9_55 = arith.constant 9 : index
    %150 = memref.load %arg3[%c9_55] : memref<10xf32, #tpu.memory_space<smem>>
    %151 = vector.broadcast %150 : f32 to vector<8x128xf32>
    %152 = arith.addf %149, %151 : vector<8x128xf32>
    %c9_56 = arith.constant 9 : index
    %153 = memref.load %arg4[%c9_56] : memref<10xf32, #tpu.memory_space<smem>>
    %154 = math.tanh %152 : vector<8x128xf32>
    %155 = vector.broadcast %153 : f32 to vector<8x128xf32>
    %156 = arith.mulf %155, %154 : vector<8x128xf32>
    %157 = arith.addf %142, %156 : vector<8x128xf32>
    %c0_57 = arith.constant 0 : index
    %c0_58 = arith.constant 0 : index
    %158 = vector.load %arg6[%c0_57, %c0_58] : memref<8x128xf32, #tpu.memory_space<vmem>>, vector<8x128xf32>
    tpu.vector_store %arg6[%c0_57, %c0_58], %157 {strides = array<i32>} : memref<8x128xf32, #tpu.memory_space<vmem>>, vector<8x128xf32>,
    return
  }
  func.func @transform_0(%arg0: i32) -> (i32, i32, i32) {
    %c0_i32 = arith.constant 0 : i32
    %c0_i32_0 = arith.constant 0 : i32
    %c0_i32_1 = arith.constant 0 : i32
    return %c0_i32, %arg0, %c0_i32_0 : i32, i32, i32
  }
  func.func @transform_1(%arg0: i32) -> (i32, i32) {
    %c0_i32 = arith.constant 0 : i32
    %c0_i32_0 = arith.constant 0 : i32
    %c0_i32_1 = arith.constant 0 : i32
    return %c0_i32, %c0_i32_0 : i32, i32
  }
  func.func @transform_2(%arg0: i32) -> i32 {
    %c0_i32 = arith.constant 0 : i32
    %c0_i32_0 = arith.constant 0 : i32
    return %c0_i32 : i32
  }
  func.func @transform_3(%arg0: i32) -> i32 {
    %c0_i32 = arith.constant 0 : i32
    %c0_i32_0 = arith.constant 0 : i32
    return %c0_i32 : i32
  }
  func.func @transform_4(%arg0: i32) -> i32 {
    %c0_i32 = arith.constant 0 : i32
    %c0_i32_0 = arith.constant 0 : i32
    return %c0_i32 : i32
  }
  func.func @transform_5(%arg0: i32) -> (i32, i32) {
    %c0_i32 = arith.constant 0 : i32
    %c0_i32_0 = arith.constant 0 : i32
    return %arg0, %c0_i32 : i32, i32
  }
}

</mosaic_0001>

<bundles_post_ra>
// kernel: tpu_custom_call.1
= control target key start
LH: loop header
LB: loop body
LE: loop exit
PB: predicated region body
PF: predicated region fallthrough
CT: control target
= control target key end

     0   :  { %11 = vsyncpa [#allocation4], 0  ;;  %s530_s0 = inlined_call_operand.hbm [shape: f32[2,8,128], index: 0, kind: input, shape index: {}]   ;;  %s531_s1 = inlined_call_operand.vmem [shape: f32[2,10], index: 1, kind: input, shape index: {}]   ;;  %s532_s2 = inlined_call_operand.vmem [shape: f32[10], index: 2, kind: input, shape index: {}]   ;;  %s533_s3 = inlined_call_operand.vmem [shape: f32[10], index: 3, kind: input, shape index: {}]   ;;  %s534_s4 = inlined_call_operand.<no memory space> [shape: f32[1], index: 4, kind: input, shape index: {}]   ;;  %s535_s5 = inlined_call_operand.hbm [shape: f32[8,128], index: 5, kind: output, shape index: {}]  }
   0x1   :  { %12 = vsyncpa [#allocation6], 0 }
   0x2   :  { %13 = vsyncpa [#allocation9], 0  ;;  %s42_s20 = sshll.u32 %s532_s2, 4  ;;  %s43_s20 = int_to_ptr.vmem [resolvable:$true] %s42_s20 }
   0x3   :  { %14 = vsyncpa [#allocation5], 0  ;;  %s19_s23 = sshll.u32 %s530_s0, 4  ;;  %s406_s24 = smov [#allocation8]   ;;  %s20_s23 = int_to_ptr.hbm [resolvable:$true] %s19_s23 }
   0x4   :  { %45 = dma.vmem_to_smem %s43_s20, 16, %s406_s24, [#allocation9]  }
   0x5   :  { %s407_s25 = smov [#allocation3]   ;;  %s408_s27 = smov 128  }
   0x6   :  { %s21_s26 = sshll.u32 %s407_s25, 4  ;;  %s409_s28 = smov 8   ;;  %s22_s26 = int_to_ptr.vmem [resolvable:$true] %s21_s26 }
   0x7   :  { %27 = dma.hbm_to_vmem [thread:$0]  %s20_s23, 256, %s22_s26, [#allocation4], %s408_s27, %s408_s27, %s409_s28  }
   0x8   :  { %s33_s6 = sshll.u32 %s531_s1, 4  ;;  %s51_s8 = sshll.u32 %s533_s3, 4  ;;  %s34_s6 = int_to_ptr.vmem [resolvable:$true] %s33_s6  ;;  %s52_s8 = int_to_ptr.vmem [resolvable:$true] %s51_s8 }
   0x9   :  { %s410_s9 = smov [#allocation7]   ;;  %s411_s0 = smov [#allocation10]  }
   0xa   :  { %36 = dma.vmem_to_smem %s34_s6, 32, %s410_s9, [#allocation6]  }
   0xb   :  { %54 = dma.vmem_to_smem %s52_s8, 16, %s411_s0, [#allocation9]  }
   0xc   :  { %398 = dma.done.wait [#allocation4], 256  }
   0xd   :  { %399 = vsyncadd [#allocation4], 4294967040 }
   0xe   :  { %400 = dma.done.wait [#allocation6], 32  }
   0xf   :  { %401 = vsyncadd [#allocation6], 4294967264 }
  0x10   :  { %402 = dma.done.wait [#allocation9], 32  }
  0x11   :  { %403 = vsyncadd [#allocation9], 4294967264 }
  0x12   :  { %73 = sfence }
  0x13   :  { %s80_s10 = sld [smem:[#allocation7]]  ;;  %v455_v0 = vld [vmem:[#allocation3] sm:$0xff]  ;;  %v457_v1 = vld [vmem:[#allocation3 + $0x8] sm:$0xff]  ;;  %v78_v27 = vstv %s534_s4 }
  0x14   :  { %s250_s11 = sld [smem:[#allocation7 + $0x80]] }
  0x15   :  { %s87_s1 = sld [smem:[#allocation8]] }
  0x16   :  { %s251_s12 = sld [smem:[#allocation7 + $0x1]] }
  0x17   :  { %s252_s3 = sld [smem:[#allocation7 + $0x81]] }
  0x18   :  { %s253_s13 = sld [smem:[#allocation8 + $0x1]] }
  0x19   :  { %v81_v2 = vstv %s80_s10  ;;  %s460_s14 = sld [smem:[#allocation10]] }
  0x1a   :  { %v82_v3 = vmul.f32 %v81_v2, %v455_v0  ;;  %v84_v4 = vstv %s250_s11  ;;  %s255_s15 = sld [smem:[#allocation7 + $0x2]] }
  0x1b   :  { %v85_v5 = vmul.f32 %v84_v4, %v457_v1  ;;  %v88_v6 = vstv %s87_s1  ;;  %s256_s16 = sld [smem:[#allocation7 + $0x82]] }
  0x1c   :  { %v96_v8 = vstv %s251_s12  ;;  %s463_s17 = sld [smem:[#allocation8 + $0x2]] }
  0x1d   :  { %v86_v7 = vadd.f32 %v85_v5, %v82_v3  ;;  %v97_v9 = vmul.f32 %v96_v8, %v455_v0  ;;  %v99_v10 = vstv %s252_s3  ;;  %s466_s18 = sld [smem:[#allocation10 + $0x1]] }
  0x1e   :  { %v100_v12 = vmul.f32 %v99_v10, %v457_v1  ;;  %s259_s19 = sld [smem:[#allocation7 + $0x3]]  ;;  %v103_v13 = vstv %s253_s13 }
  0x1f   :  { %v89_v11 = vadd.f32 %v88_v6, %v86_v7  ;;  %s260_s20 = sld [smem:[#allocation7 + $0x83]]  ;;  %v92_v21 = vstv %s460_s14 }
  0x20   :  { %v101_v14 = vadd.f32 %v100_v12, %v97_v9  ;;  %v111_v15 = vstv %s255_s15  ;;  %s469_s21 = sld [smem:[#allocation8 + $0x3]] }
  0x21   :  { %294 = vtanh.f32 %v89_v11  ;;  %v112_v16 = vmul.f32 %v111_v15, %v455_v0  ;;  %v114_v17 = vstv %s256_s16  ;;  %s472_s22 = sld [smem:[#allocation10 + $0x2]] }
  0x22   :  { %v104_v18 = vadd.f32 %v103_v13, %v101_v14  ;;  %v115_v19 = vmul.f32 %v114_v17, %v457_v1  ;;  %s263_s23 = sld [smem:[#allocation7 + $0x4]]  ;;  %v118_v20 = vstv %s463_s17 }
  0x23   :  { %s264_s24 = sld [smem:[#allocation7 + $0x84]]  ;;  %v107_v32 = vstv %s466_s18 }
  0x24   :  { %296 = vtanh.f32 %v104_v18  ;;  %v116_v22 = vadd.f32 %v115_v19, %v112_v16  ;;  %v126_v23 = vstv %s259_s19  ;;  %s477_s25 = sld [smem:[#allocation8 + $0x4]] }
  0x25   :  { %v127_v24 = vmul.f32 %v126_v23, %v455_v0  ;;  %v129_v25 = vstv %s260_s20  ;;  %s480_s26 = sld [smem:[#allocation10 + $0x3]]  ;;  %s412_s20 = smov [#allocation11]  }
  0x26   :  { %v119_v28 = vadd.f32 %v118_v20, %v116_v22  ;;  %v130_v29 = vmul.f32 %v129_v25, %v457_v1  ;;  %s267_s29 = sld [smem:[#allocation7 + $0x5]]  ;;  %v133_v31 = vstv %s469_s21  ;;  %s236_s21 = sshll.u32 %s412_s20, 4  ;;  %s237_s21 = int_to_ptr.vmem [resolvable:$true] %s236_s21 }
  0x27   :  { %v295_v26 = vpop.eup %294  ;;  %s268_s30 = sld [smem:[#allocation7 + $0x85]]  ;;  %v122_v43 = vstv %s472_s22 }
  0x28   :  { %v93_v30 = vmul.f32 %v295_v26, %v92_v21  ;;  %298 = vtanh.f32 %v119_v28  ;;  %v131_v33 = vadd.f32 %v130_v29, %v127_v24  ;;  %v141_v34 = vstv %s263_s23  ;;  %s488_s6 = sld [smem:[#allocation8 + $0x5]] }
  0x29   :  { %v142_v36 = vmul.f32 %v141_v34, %v455_v0  ;;  %v144_v37 = vstv %s264_s24  ;;  %s491_s4 = sld [smem:[#allocation10 + $0x4]]  ;;  %s238_s24 = sshll.u32 %s535_s5, 4  ;;  %s239_s24 = int_to_ptr.hbm [resolvable:$true] %s238_s24 }
  0x2a   :  { %v94_v35 = vadd.f32 %v93_v30, %v78_v27  ;;  %v297_v38 = vpop.eup %296  ;;  %v134_v39 = vadd.f32 %v133_v31, %v131_v33  ;;  %v145_v40 = vmul.f32 %v144_v37, %v457_v1  ;;  %s271_s2 = sld [smem:[#allocation7 + $0x6]]  ;;  %v148_v42 = vstv %s477_s25 }
  0x2b   :  { %v108_v41 = vmul.f32 %v297_v38, %v107_v32  ;;  %s272_s7 = sld [smem:[#allocation7 + $0x86]]  ;;  %v137_v54 = vstv %s480_s26 }
  0x2c   :  { %300 = vtanh.f32 %v134_v39  ;;  %v146_v44 = vadd.f32 %v145_v40, %v142_v36  ;;  %v156_v45 = vstv %s267_s29  ;;  %s496_s8 = sld [smem:[#allocation8 + $0x6]] }
  0x2d   :  { %v109_v46 = vadd.f32 %v108_v41, %v94_v35  ;;  %v157_v47 = vmul.f32 %v156_v45, %v455_v0  ;;  %v159_v48 = vstv %s268_s30  ;;  %s499_s9 = sld [smem:[#allocation10 + $0x5]] }
  0x2e   :  { %v299_v49 = vpop.eup %298  ;;  %v149_v50 = vadd.f32 %v148_v42, %v146_v44  ;;  %v160_v51 = vmul.f32 %v159_v48, %v457_v1  ;;  %s275_s0 = sld [smem:[#allocation7 + $0x7]]  ;;  %v163_v53 = vstv %s488_s6 }
  0x2f   :  { %v123_v52 = vmul.f32 %v299_v49, %v122_v43  ;;  %s276_s10 = sld [smem:[#allocation7 + $0x87]]  ;;  %v152_v3 = vstv %s491_s4 }
  0x30   :  { %302 = vtanh.f32 %v149_v50  ;;  %v161_v55 = vadd.f32 %v160_v51, %v157_v47  ;;  %v171_v56 = vstv %s271_s2  ;;  %s504_s11 = sld [smem:[#allocation8 + $0x7]] }
  0x31   :  { %v124_v57 = vadd.f32 %v123_v52, %v109_v46  ;;  %v172_v58 = vmul.f32 %v171_v56, %v455_v0  ;;  %v174_v59 = vstv %s272_s7  ;;  %s507_s1 = sld [smem:[#allocation10 + $0x6]] }
  0x32   :  { %v301_v60 = vpop.eup %300  ;;  %v164_v61 = vadd.f32 %v163_v53, %v161_v55  ;;  %v175_v62 = vmul.f32 %v174_v59, %v457_v1  ;;  %s279_s12 = sld [smem:[#allocation7 + $0x8]]  ;;  %v178_v2 = vstv %s496_s8 }
  0x33   :  { %v138_v63 = vmul.f32 %v301_v60, %v137_v54  ;;  %s280_s3 = sld [smem:[#allocation7 + $0x88]]  ;;  %v167_v14 = vstv %s499_s9 }
  0x34   :  { %304 = vtanh.f32 %v164_v61  ;;  %v176_v4 = vadd.f32 %v175_v62, %v172_v58  ;;  %v186_v5 = vstv %s275_s0  ;;  %s512_s13 = sld [smem:[#allocation8 + $0x8]] }
  0x35   :  { %v139_v6 = vadd.f32 %v138_v63, %v124_v57  ;;  %v187_v7 = vmul.f32 %v186_v5, %v455_v0  ;;  %v189_v8 = vstv %s276_s10  ;;  %s515_s14 = sld [smem:[#allocation10 + $0x7]] }
  0x36   :  { %v303_v9 = vpop.eup %302  ;;  %v179_v10 = vadd.f32 %v178_v2, %v176_v4  ;;  %v190_v11 = vmul.f32 %v189_v8, %v457_v1  ;;  %s283_s15 = sld [smem:[#allocation7 + $0x9]]  ;;  %v193_v13 = vstv %s504_s11 }
  0x37   :  { %v153_v12 = vmul.f32 %v303_v9, %v152_v3  ;;  %s284_s16 = sld [smem:[#allocation7 + $0x89]]  ;;  %v182_v25 = vstv %s507_s1 }
  0x38   :  { %306 = vtanh.f32 %v179_v10  ;;  %v191_v15 = vadd.f32 %v190_v11, %v187_v7  ;;  %v201_v16 = vstv %s279_s12  ;;  %s285_s17 = sld [smem:[#allocation8 + $0x9]] }
  0x39   :  { %v154_v17 = vadd.f32 %v153_v12, %v139_v6  ;;  %v202_v18 = vmul.f32 %v201_v16, %v455_v0  ;;  %v204_v19 = vstv %s280_s3  ;;  %s282_s18 = sld [smem:[#allocation10 + $0x8]] }
  0x3a   :  { %v305_v20 = vpop.eup %304  ;;  %v194_v21 = vadd.f32 %v193_v13, %v191_v15  ;;  %v205_v22 = vmul.f32 %v204_v19, %v457_v1  ;;  %v208_v24 = vstv %s512_s13  ;;  %s286_s19 = sld [smem:[#allocation10 + $0x9]] }
  0x3b   :  { %v168_v23 = vmul.f32 %v305_v20, %v167_v14  ;;  %v197_v36 = vstv %s515_s14 }
  0x3c   :  { %308 = vtanh.f32 %v194_v21  ;;  %v206_v26 = vadd.f32 %v205_v22, %v202_v18  ;;  %v216_v27 = vstv %s283_s15 }
  0x3d   :  { %v169_v28 = vadd.f32 %v168_v23, %v154_v17  ;;  %v217_v29 = vmul.f32 %v216_v27, %v455_v0  ;;  %v219_v30 = vstv %s284_s16 }
  0x3e   :  { %v307_v31 = vpop.eup %306  ;;  %v209_v32 = vadd.f32 %v208_v24, %v206_v26  ;;  %v220_v33 = vmul.f32 %v219_v30, %v457_v1  ;;  %v223_v35 = vstv %s285_s17 }
  0x3f   :  { %v183_v34 = vmul.f32 %v307_v31, %v182_v25  ;;  %v212_v42 = vstv %s282_s18 }
  0x40   :  { %310 = vtanh.f32 %v209_v32  ;;  %v221_v37 = vadd.f32 %v220_v33, %v217_v29  ;;  %v227_v45 = vstv %s286_s19 }
  0x41   :  { %v184_v38 = vadd.f32 %v183_v34, %v169_v28 }
  0x42   :  { %v309_v39 = vpop.eup %308  ;;  %v224_v40 = vadd.f32 %v223_v35, %v221_v37 }
  0x43   :  { %v198_v41 = vmul.f32 %v309_v39, %v197_v36 }
  0x44   :  { %312 = vtanh.f32 %v224_v40 }
  0x45   :  { %v199_v43 = vadd.f32 %v198_v41, %v184_v38 }
  0x46   :  { %v311_v44 = vpop.eup %310 }
  0x47   :  { %v213_v0 = vmul.f32 %v311_v44, %v212_v42 }
  0x49   :  { %v214_v46 = vadd.f32 %v213_v0, %v199_v43 }
  0x4a   :  { %v313_v47 = vpop.eup %312 }
  0x4b   :  { %v228_v1 = vmul.f32 %v313_v47, %v227_v45 }
  0x4d   :  { %v229_v48 = vadd.f32 %v228_v1, %v214_v46 }
  0x4f   :  { %230 = vst [vmem:[#allocation11] sm:$0xff] %v229_v48 }
  0x50   :  { %241 = dma.vmem_to_hbm [thread:$0]  %s237_s21, 128, %s239_s24, [#allocation5]  }
  0x51   :  { %404 = dma.done.wait [#allocation5], 128  }
  0x52   :  { %405 = vsyncadd [#allocation5], 4294967168 }
  0x53   :  { %246 = vsyncpa [#allocation4], 1 }
  0x54   :  { %247 = vsyncpa [#allocation5], 1 }
  0x55   :  { %248 = vsyncpa [#allocation6], 1 }
  0x56   :  { %249 = vsyncpa [#allocation9], 1 }

</bundles_post_ra>
